<compile_context>
chip_gen: v7x
topology: tpu7x:2x2x1
jax: 0.10.0
libtpu: 0.0.40
codegen_flags: <defaults>
</compile_context>

<pallas_src>
import functools

import jax
import jax.numpy as jnp
import numpy as np
from jax import lax
from jax.experimental import pallas as pl
from jax.experimental.pallas import tpu as pltpu


def _tree_sum(terms):
    """Pairwise-tree sum: same op count as a serial chain, ~log2 dependence depth."""
    while len(terms) > 1:
        nxt = [terms[i] + terms[i + 1] for i in range(0, len(terms) - 1, 2)]
        if len(terms) % 2:
            nxt.append(terms[-1])
        terms = nxt
    return terms[0]


def _fused_kernel(phases_ref, w1_ref, b1_ref, w2_ref, b2_ref, o_ref, ypad_ref, *, unroll):
    """Fused conv1(3x3,s2,p1, 1->1)+ReLU and conv2(3x3,s1,p1, 1->Cout)+ReLU.

    phases_ref: [4, Hout+1, Wout+1] VMEM — stride-2 phase planes of the padded input,
                phases[2*dy+dx][i, j] == xpad[2i+dy, 2j+dx].
    w1_ref: [9] SMEM, b1_ref: [1] SMEM          (conv1 weights, k = 3*ky + kx)
    w2_ref: [Cout*9] SMEM, b2_ref: [Cout] SMEM  (conv2 weights, idx = c*9 + 3*ky + kx)
    o_ref:  [CT, Hout, Wout] VMEM — NCHW output block for channel tile j.
    ypad_ref: [Hout+2, Wout+2] VMEM scratch — zero-padded conv1 output (conv2 halo).
    """
    ct, hout, wout = o_ref.shape
    j = pl.program_id(1)

    # ---- conv1: 9 scalar-broadcast FMAs over the stride-2 phase planes (VPU) ----
    planes = [phases_ref[i] for i in range(4)]
    t1 = []
    for k in range(9):
        ky, kx = k // 3, k % 3
        plane = planes[2 * (ky % 2) + (kx % 2)]
        tap = plane[ky // 2:ky // 2 + hout, kx // 2:kx // 2 + wout]
        t1.append(w1_ref[k] * tap)
    y = jnp.maximum(_tree_sum(t1) + b1_ref[0], 0.0)

    # Zero-padded conv1 output kept resident in VMEM (halo for the stride-1 conv2).
    ypad_ref[...] = jnp.zeros_like(ypad_ref)
    ypad_ref[1:hout + 1, 1:wout + 1] = y

    # ---- conv2: per-channel 9-tap scalar FMAs + bias + ReLU, direct NCHW store ----
    ypad = ypad_ref[...]
    taps = [ypad[ky:ky + hout, kx:kx + wout] for ky in range(3) for kx in range(3)]

    def channel_block(c_outer, carry):
        for u in range(unroll):                      # manual unroll (static Python)
            c_local = c_outer * unroll + u
            c = j * ct + c_local                     # global output channel
            base = c * 9
            acc = _tree_sum([w2_ref[base + k] * taps[k] for k in range(9)])
            o_ref[c_local] = jnp.maximum(acc + b2_ref[c], 0.0)
        return carry

    lax.fori_loop(0, ct // unroll, channel_block, 0)


def _pick_channel_tile(cout, hout, wout, block_budget_bytes=8 * 1024 * 1024, cap=128):
    """Largest divisor of `cout` whose [ct, Hout, Wout] f32 output block fits the budget.

    Budget is per block; Pallas double-buffers the output, so peak VMEM ~= 2x this plus
    the (small) phases block and ypad scratch.
    """
    per_channel_bytes = hout * wout * 4
    max_ct = int(max(1, min(cap, block_budget_bytes // per_channel_bytes)))
    ct = 1
    for d in range(1, cout + 1):
        if cout % d == 0 and d <= max_ct:
            ct = d
    return ct


@jax.jit
def simple_resize_cnn_forward(x, w1, b1, w2, b2):
    """x: [B, H, W] float (forward() unsqueezes the channel dim itself).

    Returns [B, Cout, Hout, Wout] float32 (NCHW), matching the PyTorch module.
    """
    B, H, W = x.shape
    Cout = w2.shape[0]
    Hout = (H - 1) // 2 + 1
    Wout = (W - 1) // 2 + 1

    # Stride-2 phase decomposition of the zero-padded input (cheap XLA glue, ~1x input
    # bytes): phases[:, 2*dy+dx, i, j] == xpad[:, 2i+dy, 2j+dx].
    xpad = jnp.pad(x.astype(jnp.float32),
                   ((0, 0), (1, 2 * Hout + 1 - H), (1, 2 * Wout + 1 - W)))
    phases = jnp.stack(
        [xpad[:, dy:dy + 2 * Hout + 1:2, dx:dx + 2 * Wout + 1:2]
         for dy in (0, 1) for dx in (0, 1)],
        axis=1)                                              # [B, 4, Hout+1, Wout+1]

    w1_s = w1.reshape(9).astype(jnp.float32)                 # k = 3*ky + kx
    b1_s = b1.reshape(1).astype(jnp.float32)
    w2_s = w2.reshape(Cout * 9).astype(jnp.float32)          # idx = c*9 + 3*ky + kx
    b2_s = b2.reshape(Cout).astype(jnp.float32)

    ct = _pick_channel_tile(Cout, Hout, Wout)
    unroll = 4 if ct % 4 == 0 else (2 if ct % 2 == 0 else 1)
    grid = (B, Cout // ct)

    # Advisory scheduling hint: ~18 flops per conv-output element, HBM-write dominated.
    flops = int(2 * 9 * B * Hout * Wout * (Cout + grid[1]))
    bytes_accessed = int(4 * (B * 4 * (Hout + 1) * (Wout + 1)
                              + 10 + 10 * Cout
                              + B * Cout * Hout * Wout))

    kernel = functools.partial(_fused_kernel, unroll=unroll)

    return pl.pallas_call(
        kernel,
        out_shape=jax.ShapeDtypeStruct((B, Cout, Hout, Wout), jnp.float32),
        grid=grid,
        in_specs=[
            pl.BlockSpec((None, 4, Hout + 1, Wout + 1), lambda b, j: (b, 0, 0, 0)),
            pl.BlockSpec(memory_space=pltpu.MemorySpace.SMEM),
            pl.BlockSpec(memory_space=pltpu.MemorySpace.SMEM),
            pl.BlockSpec(memory_space=pltpu.MemorySpace.SMEM),
            pl.BlockSpec(memory_space=pltpu.MemorySpace.SMEM),
        ],
        out_specs=pl.BlockSpec((None, ct, Hout, Wout), lambda b, j: (b, j, 0, 0)),
        scratch_shapes=[pltpu.VMEM((Hout + 2, Wout + 2), jnp.float32)],
        compiler_params=pltpu.CompilerParams(
            dimension_semantics=("parallel", "parallel"),
            vmem_limit_bytes=32 * 1024 * 1024),
        cost_estimate=pl.CostEstimate(flops=flops, transcendentals=0,
                                      bytes_accessed=bytes_accessed),
    )(phases, w1_s, b1_s, w2_s, b2_s)


def _reference_forward(x, w1, b1, w2, b2):
    """Pure-JAX reference matching the PyTorch module exactly."""
    xn = x[:, None, :, :].astype(jnp.float32)
    dn = ("NCHW", "OIHW", "NCHW")
    y = lax.conv_general_dilated(xn, w1, (2, 2), ((1, 1), (1, 1)), dimension_numbers=dn)
    y = jax.nn.relu(y + b1.reshape(1, -1, 1, 1))
    z = lax.conv_general_dilated(y, w2, (1, 1), ((1, 1), (1, 1)), dimension_numbers=dn)
    z = jax.nn.relu(z + b2.reshape(1, -1, 1, 1))
    return z


if __name__ == "__main__":
    key = jax.random.PRNGKey(0)
    k_x, k_w1, k_b1, k_w2, k_b2 = jax.random.split(key, 5)

    B, H, W = 2, 16, 16
    Cout = 256

    x = jax.random.normal(k_x, (B, H, W), dtype=jnp.float32)

    # Deterministic synthetic params (PyTorch-style U(-1/sqrt(fan_in), +1/sqrt(fan_in)), fan_in=9)
    bound = 1.0 / 3.0
    w1 = jax.random.uniform(k_w1, (1, 1, 3, 3), jnp.float32, -bound, bound)
    b1 = jax.random.uniform(k_b1, (1,), jnp.float32, -bound, bound)
    w2 = jax.random.uniform(k_w2, (Cout, 1, 3, 3), jnp.float32, -bound, bound)
    b2 = jax.random.uniform(k_b2, (Cout,), jnp.float32, -bound, bound)

    # TODO(synk): self.upsample (nn.Upsample to (242, 324)) is unused in forward(), so it is
    # intentionally not implemented.
    out = simple_resize_cnn_forward(x, w1, b1, w2, b2)
    out = jax.block_until_ready(out)

    ref = _reference_forward(x, w1, b1, w2, b2)
    assert out.shape == (B, Cout, H // 2, W // 2), out.shape
    np.testing.assert_allclose(np.asarray(out), np.asarray(ref), rtol=1e-4, atol=1e-4)

    print("KERNEL_OK")
</pallas_src>

<mosaic_0001>
module attributes {stable_mosaic.version = 11 : i64} {
  func.func @_fused_kernel(%arg0: i32, %arg1: i32, %arg2: memref<1x4x9x9xf32, #tpu.memory_space<vmem>>, %arg3: memref<9xf32, #tpu.memory_space<smem>>, %arg4: memref<1xf32, #tpu.memory_space<smem>>, %arg5: memref<2304xf32, #tpu.memory_space<smem>>, %arg6: memref<256xf32, #tpu.memory_space<smem>>, %arg7: memref<1x128x8x8xf32, #tpu.memory_space<vmem>>, %arg8: memref<10x10xf32, #tpu.memory_space<vmem>>) attributes {dimension_semantics = [#tpu.dimension_semantics<parallel>, #tpu.dimension_semantics<parallel>], iteration_bounds = array<i64: 2, 2>, scalar_prefetch = 0 : i64, scratch_operands = 1 : i64, tpu.core_type = #tpu.core_type<tc>, window_params = [{transform_indices = @transform_0, window_bounds = array<i64: 1, 4, 9, 9>}, {transform_indices = @transform_1, window_bounds = array<i64: 9>}, {transform_indices = @transform_2, window_bounds = array<i64: 1>}, {transform_indices = @transform_3, window_bounds = array<i64: 2304>}, {transform_indices = @transform_4, window_bounds = array<i64: 256>}, {transform_indices = @transform_5, window_bounds = array<i64: 1, 128, 8, 8>}]} {
    %c0 = arith.constant 0 : index
    %c0_0 = arith.constant 0 : index
    %c0_1 = arith.constant 0 : index
    %c0_2 = arith.constant 0 : index
    %0 = vector.load %arg2[%c0, %c0_0, %c0_1, %c0_2] : memref<1x4x9x9xf32, #tpu.memory_space<vmem>>, vector<1x1x9x9xf32>
    %1 = vector.shape_cast %0 : vector<1x1x9x9xf32> to vector<9x9xf32>
    %c0_3 = arith.constant 0 : index
    %c1 = arith.constant 1 : index
    %c0_4 = arith.constant 0 : index
    %c0_5 = arith.constant 0 : index
    %2 = vector.load %arg2[%c0_3, %c1, %c0_4, %c0_5] : memref<1x4x9x9xf32, #tpu.memory_space<vmem>>, vector<1x1x9x9xf32>
    %3 = vector.shape_cast %2 : vector<1x1x9x9xf32> to vector<9x9xf32>
    %c0_6 = arith.constant 0 : index
    %c2 = arith.constant 2 : index
    %c0_7 = arith.constant 0 : index
    %c0_8 = arith.constant 0 : index
    %4 = vector.load %arg2[%c0_6, %c2, %c0_7, %c0_8] : memref<1x4x9x9xf32, #tpu.memory_space<vmem>>, vector<1x1x9x9xf32>
    %5 = vector.shape_cast %4 : vector<1x1x9x9xf32> to vector<9x9xf32>
    %c0_9 = arith.constant 0 : index
    %c3 = arith.constant 3 : index
    %c0_10 = arith.constant 0 : index
    %c0_11 = arith.constant 0 : index
    %6 = vector.load %arg2[%c0_9, %c3, %c0_10, %c0_11] : memref<1x4x9x9xf32, #tpu.memory_space<vmem>>, vector<1x1x9x9xf32>
    %7 = vector.shape_cast %6 : vector<1x1x9x9xf32> to vector<9x9xf32>
    %8 = vector.extract_strided_slice %1 {offsets = [0, 0], sizes = [8, 8], strides = [1, 1]} : vector<9x9xf32> to vector<8x8xf32>
    %c0_12 = arith.constant 0 : index
    %9 = memref.load %arg3[%c0_12] : memref<9xf32, #tpu.memory_space<smem>>
    %10 = vector.broadcast %9 : f32 to vector<8x8xf32>
    %11 = arith.mulf %10, %8 : vector<8x8xf32>
    %12 = vector.extract_strided_slice %3 {offsets = [0, 0], sizes = [8, 8], strides = [1, 1]} : vector<9x9xf32> to vector<8x8xf32>
    %c1_13 = arith.constant 1 : index
    %13 = memref.load %arg3[%c1_13] : memref<9xf32, #tpu.memory_space<smem>>
    %14 = vector.broadcast %13 : f32 to vector<8x8xf32>
    %15 = arith.mulf %14, %12 : vector<8x8xf32>
    %16 = vector.extract_strided_slice %1 {offsets = [0, 1], sizes = [8, 8], strides = [1, 1]} : vector<9x9xf32> to vector<8x8xf32>
    %c2_14 = arith.constant 2 : index
    %17 = memref.load %arg3[%c2_14] : memref<9xf32, #tpu.memory_space<smem>>
    %18 = vector.broadcast %17 : f32 to vector<8x8xf32>
    %19 = arith.mulf %18, %16 : vector<8x8xf32>
    %20 = vector.extract_strided_slice %5 {offsets = [0, 0], sizes = [8, 8], strides = [1, 1]} : vector<9x9xf32> to vector<8x8xf32>
    %c3_15 = arith.constant 3 : index
    %21 = memref.load %arg3[%c3_15] : memref<9xf32, #tpu.memory_space<smem>>
    %22 = vector.broadcast %21 : f32 to vector<8x8xf32>
    %23 = arith.mulf %22, %20 : vector<8x8xf32>
    %24 = vector.extract_strided_slice %7 {offsets = [0, 0], sizes = [8, 8], strides = [1, 1]} : vector<9x9xf32> to vector<8x8xf32>
    %c4 = arith.constant 4 : index
    %25 = memref.load %arg3[%c4] : memref<9xf32, #tpu.memory_space<smem>>
    %26 = vector.broadcast %25 : f32 to vector<8x8xf32>
    %27 = arith.mulf %26, %24 : vector<8x8xf32>
    %28 = vector.extract_strided_slice %5 {offsets = [0, 1], sizes = [8, 8], strides = [1, 1]} : vector<9x9xf32> to vector<8x8xf32>
    %c5 = arith.constant 5 : index
    %29 = memref.load %arg3[%c5] : memref<9xf32, #tpu.memory_space<smem>>
    %30 = vector.broadcast %29 : f32 to vector<8x8xf32>
    %31 = arith.mulf %30, %28 : vector<8x8xf32>
    %32 = vector.extract_strided_slice %1 {offsets = [1, 0], sizes = [8, 8], strides = [1, 1]} : vector<9x9xf32> to vector<8x8xf32>
    %c6 = arith.constant 6 : index
    %33 = memref.load %arg3[%c6] : memref<9xf32, #tpu.memory_space<smem>>
    %34 = vector.broadcast %33 : f32 to vector<8x8xf32>
    %35 = arith.mulf %34, %32 : vector<8x8xf32>
    %36 = vector.extract_strided_slice %3 {offsets = [1, 0], sizes = [8, 8], strides = [1, 1]} : vector<9x9xf32> to vector<8x8xf32>
    %c7 = arith.constant 7 : index
    %37 = memref.load %arg3[%c7] : memref<9xf32, #tpu.memory_space<smem>>
    %38 = vector.broadcast %37 : f32 to vector<8x8xf32>
    %39 = arith.mulf %38, %36 : vector<8x8xf32>
    %40 = vector.extract_strided_slice %1 {offsets = [1, 1], sizes = [8, 8], strides = [1, 1]} : vector<9x9xf32> to vector<8x8xf32>
    %c8 = arith.constant 8 : index
    %41 = memref.load %arg3[%c8] : memref<9xf32, #tpu.memory_space<smem>>
    %42 = vector.broadcast %41 : f32 to vector<8x8xf32>
    %43 = arith.mulf %42, %40 : vector<8x8xf32>
    %44 = arith.addf %11, %15 : vector<8x8xf32>
    %45 = arith.addf %19, %23 : vector<8x8xf32>
    %46 = arith.addf %27, %31 : vector<8x8xf32>
    %47 = arith.addf %35, %39 : vector<8x8xf32>
    %48 = arith.addf %44, %45 : vector<8x8xf32>
    %49 = arith.addf %46, %47 : vector<8x8xf32>
    %50 = arith.addf %48, %49 : vector<8x8xf32>
    %51 = arith.addf %50, %43 : vector<8x8xf32>
    %c0_16 = arith.constant 0 : index
    %52 = memref.load %arg4[%c0_16] : memref<1xf32, #tpu.memory_space<smem>>
    %53 = vector.broadcast %52 : f32 to vector<8x8xf32>
    %54 = arith.addf %51, %53 : vector<8x8xf32>
    %cst = arith.constant 0.000000e+00 : f32
    %55 = vector.broadcast %cst : f32 to vector<8x8xf32>
    %56 = arith.maximumf %54, %55 : vector<8x8xf32>
    %cst_17 = arith.constant 0.000000e+00 : f32
    %57 = vector.broadcast %cst_17 : f32 to vector<10x10xf32>
    %c0_18 = arith.constant 0 : index
    %c0_19 = arith.constant 0 : index
    %58 = vector.load %arg8[%c0_18, %c0_19] : memref<10x10xf32, #tpu.memory_space<vmem>>, vector<10x10xf32>
    tpu.vector_store %arg8[%c0_18, %c0_19], %57 {strides = array<i32>} : memref<10x10xf32, #tpu.memory_space<vmem>>, vector<10x10xf32>,
    %c1_20 = arith.constant 1 : index
    %c1_21 = arith.constant 1 : index
    %59 = vector.load %arg8[%c1_20, %c1_21] : memref<10x10xf32, #tpu.memory_space<vmem>>, vector<8x8xf32>
    tpu.vector_store %arg8[%c1_20, %c1_21], %56 {strides = array<i32>} : memref<10x10xf32, #tpu.memory_space<vmem>>, vector<8x8xf32>,
    %c0_22 = arith.constant 0 : index
    %c0_23 = arith.constant 0 : index
    %60 = vector.load %arg8[%c0_22, %c0_23] : memref<10x10xf32, #tpu.memory_space<vmem>>, vector<10x10xf32>
    %61 = vector.extract_strided_slice %60 {offsets = [0, 0], sizes = [8, 8], strides = [1, 1]} : vector<10x10xf32> to vector<8x8xf32>
    %62 = vector.extract_strided_slice %60 {offsets = [0, 1], sizes = [8, 8], strides = [1, 1]} : vector<10x10xf32> to vector<8x8xf32>
    %63 = vector.extract_strided_slice %60 {offsets = [0, 2], sizes = [8, 8], strides = [1, 1]} : vector<10x10xf32> to vector<8x8xf32>
    %64 = vector.extract_strided_slice %60 {offsets = [1, 0], sizes = [8, 8], strides = [1, 1]} : vector<10x10xf32> to vector<8x8xf32>
    %65 = vector.extract_strided_slice %60 {offsets = [1, 1], sizes = [8, 8], strides = [1, 1]} : vector<10x10xf32> to vector<8x8xf32>
    %66 = vector.extract_strided_slice %60 {offsets = [1, 2], sizes = [8, 8], strides = [1, 1]} : vector<10x10xf32> to vector<8x8xf32>
    %67 = vector.extract_strided_slice %60 {offsets = [2, 0], sizes = [8, 8], strides = [1, 1]} : vector<10x10xf32> to vector<8x8xf32>
    %68 = vector.extract_strided_slice %60 {offsets = [2, 1], sizes = [8, 8], strides = [1, 1]} : vector<10x10xf32> to vector<8x8xf32>
    %69 = vector.extract_strided_slice %60 {offsets = [2, 2], sizes = [8, 8], strides = [1, 1]} : vector<10x10xf32> to vector<8x8xf32>
    %c0_i32 = arith.constant 0 : i32
    %c32_i32 = arith.constant 32 : i32
    %70 = arith.addi %c0_i32, %c32_i32 : i32
    %c1_i32 = arith.constant 1 : i32
    scf.for %arg9 = %c0_i32 to %70 step %c1_i32  : i32 {
      %c4_i32 = arith.constant 4 : i32
      %71 = arith.muli %arg9, %c4_i32 : i32
      %c0_i32_25 = arith.constant 0 : i32
      %72 = arith.addi %71, %c0_i32_25 : i32
      %c128_i32 = arith.constant 128 : i32
      %73 = arith.muli %arg1, %c128_i32 : i32
      %74 = arith.addi %73, %72 : i32
      %c9_i32 = arith.constant 9 : i32
      %75 = arith.muli %74, %c9_i32 : i32
      %c0_i32_26 = arith.constant 0 : i32
      %76 = arith.addi %75, %c0_i32_26 : i32
      %77 = arith.index_cast %76 : i32 to index
      %78 = memref.load %arg5[%77] : memref<2304xf32, #tpu.memory_space<smem>>
      %79 = vector.broadcast %78 : f32 to vector<8x8xf32>
      %80 = arith.mulf %79, %61 : vector<8x8xf32>
      %c1_i32_27 = arith.constant 1 : i32
      %81 = arith.addi %75, %c1_i32_27 : i32
      %82 = arith.index_cast %81 : i32 to index
      %83 = memref.load %arg5[%82] : memref<2304xf32, #tpu.memory_space<smem>>
      %84 = vector.broadcast %83 : f32 to vector<8x8xf32>
      %85 = arith.mulf %84, %62 : vector<8x8xf32>
      %c2_i32 = arith.constant 2 : i32
      %86 = arith.addi %75, %c2_i32 : i32
      %87 = arith.index_cast %86 : i32 to index
      %88 = memref.load %arg5[%87] : memref<2304xf32, #tpu.memory_space<smem>>
      %89 = vector.broadcast %88 : f32 to vector<8x8xf32>
      %90 = arith.mulf %89, %63 : vector<8x8xf32>
      %c3_i32 = arith.constant 3 : i32
      %91 = arith.addi %75, %c3_i32 : i32
      %92 = arith.index_cast %91 : i32 to index
      %93 = memref.load %arg5[%92] : memref<2304xf32, #tpu.memory_space<smem>>
      %94 = vector.broadcast %93 : f32 to vector<8x8xf32>
      %95 = arith.mulf %94, %64 : vector<8x8xf32>
      %c4_i32_28 = arith.constant 4 : i32
      %96 = arith.addi %75, %c4_i32_28 : i32
      %97 = arith.index_cast %96 : i32 to index
      %98 = memref.load %arg5[%97] : memref<2304xf32, #tpu.memory_space<smem>>
      %99 = vector.broadcast %98 : f32 to vector<8x8xf32>
      %100 = arith.mulf %99, %65 : vector<8x8xf32>
      %c5_i32 = arith.constant 5 : i32
      %101 = arith.addi %75, %c5_i32 : i32
      %102 = arith.index_cast %101 : i32 to index
      %103 = memref.load %arg5[%102] : memref<2304xf32, #tpu.memory_space<smem>>
      %104 = vector.broadcast %103 : f32 to vector<8x8xf32>
      %105 = arith.mulf %104, %66 : vector<8x8xf32>
      %c6_i32 = arith.constant 6 : i32
      %106 = arith.addi %75, %c6_i32 : i32
      %107 = arith.index_cast %106 : i32 to index
      %108 = memref.load %arg5[%107] : memref<2304xf32, #tpu.memory_space<smem>>
      %109 = vector.broadcast %108 : f32 to vector<8x8xf32>
      %110 = arith.mulf %109, %67 : vector<8x8xf32>
      %c7_i32 = arith.constant 7 : i32
      %111 = arith.addi %75, %c7_i32 : i32
      %112 = arith.index_cast %111 : i32 to index
      %113 = memref.load %arg5[%112] : memref<2304xf32, #tpu.memory_space<smem>>
      %114 = vector.broadcast %113 : f32 to vector<8x8xf32>
      %115 = arith.mulf %114, %68 : vector<8x8xf32>
      %c8_i32 = arith.constant 8 : i32
      %116 = arith.addi %75, %c8_i32 : i32
      %117 = arith.index_cast %116 : i32 to index
      %118 = memref.load %arg5[%117] : memref<2304xf32, #tpu.memory_space<smem>>
      %119 = vector.broadcast %118 : f32 to vector<8x8xf32>
      %120 = arith.mulf %119, %69 : vector<8x8xf32>
      %121 = arith.addf %80, %85 : vector<8x8xf32>
      %122 = arith.addf %90, %95 : vector<8x8xf32>
      %123 = arith.addf %100, %105 : vector<8x8xf32>
      %124 = arith.addf %110, %115 : vector<8x8xf32>
      %125 = arith.addf %121, %122 : vector<8x8xf32>
      %126 = arith.addf %123, %124 : vector<8x8xf32>
      %127 = arith.addf %125, %126 : vector<8x8xf32>
      %128 = arith.addf %127, %120 : vector<8x8xf32>
      %129 = arith.index_cast %74 : i32 to index
      %130 = memref.load %arg6[%129] : memref<256xf32, #tpu.memory_space<smem>>
      %131 = vector.broadcast %130 : f32 to vector<8x8xf32>
      %132 = arith.addf %128, %131 : vector<8x8xf32>
      %cst_29 = arith.constant 0.000000e+00 : f32
      %133 = vector.broadcast %cst_29 : f32 to vector<8x8xf32>
      %134 = arith.maximumf %132, %133 : vector<8x8xf32>
      %c0_30 = arith.constant 0 : index
      %135 = arith.index_cast %72 : i32 to index
      %c0_31 = arith.constant 0 : index
      %c0_32 = arith.constant 0 : index
      %136 = vector.load %arg7[%c0_30, %135, %c0_31, %c0_32] : memref<1x128x8x8xf32, #tpu.memory_space<vmem>>, vector<1x1x8x8xf32>
      %137 = vector.shape_cast %136 : vector<1x1x8x8xf32> to vector<8x8xf32>
      %138 = vector.shape_cast %134 : vector<8x8xf32> to vector<1x1x8x8xf32>
      tpu.vector_store %arg7[%c0_30, %135, %c0_31, %c0_32], %138 {strides = array<i32>} : memref<1x128x8x8xf32, #tpu.memory_space<vmem>>, vector<1x1x8x8xf32>,
      %c4_i32_33 = arith.constant 4 : i32
      %139 = arith.muli %arg9, %c4_i32_33 : i32
      %c1_i32_34 = arith.constant 1 : i32
      %140 = arith.addi %139, %c1_i32_34 : i32
      %c128_i32_35 = arith.constant 128 : i32
      %141 = arith.muli %arg1, %c128_i32_35 : i32
      %142 = arith.addi %141, %140 : i32
      %c9_i32_36 = arith.constant 9 : i32
      %143 = arith.muli %142, %c9_i32_36 : i32
      %c0_i32_37 = arith.constant 0 : i32
      %144 = arith.addi %143, %c0_i32_37 : i32
      %145 = arith.index_cast %144 : i32 to index
      %146 = memref.load %arg5[%145] : memref<2304xf32, #tpu.memory_space<smem>>
      %147 = vector.broadcast %146 : f32 to vector<8x8xf32>
      %148 = arith.mulf %147, %61 : vector<8x8xf32>
      %c1_i32_38 = arith.constant 1 : i32
      %149 = arith.addi %143, %c1_i32_38 : i32
      %150 = arith.index_cast %149 : i32 to index
      %151 = memref.load %arg5[%150] : memref<2304xf32, #tpu.memory_space<smem>>
      %152 = vector.broadcast %151 : f32 to vector<8x8xf32>
      %153 = arith.mulf %152, %62 : vector<8x8xf32>
      %c2_i32_39 = arith.constant 2 : i32
      %154 = arith.addi %143, %c2_i32_39 : i32
      %155 = arith.index_cast %154 : i32 to index
      %156 = memref.load %arg5[%155] : memref<2304xf32, #tpu.memory_space<smem>>
      %157 = vector.broadcast %156 : f32 to vector<8x8xf32>
      %158 = arith.mulf %157, %63 : vector<8x8xf32>
      %c3_i32_40 = arith.constant 3 : i32
      %159 = arith.addi %143, %c3_i32_40 : i32
      %160 = arith.index_cast %159 : i32 to index
      %161 = memref.load %arg5[%160] : memref<2304xf32, #tpu.memory_space<smem>>
      %162 = vector.broadcast %161 : f32 to vector<8x8xf32>
      %163 = arith.mulf %162, %64 : vector<8x8xf32>
      %c4_i32_41 = arith.constant 4 : i32
      %164 = arith.addi %143, %c4_i32_41 : i32
      %165 = arith.index_cast %164 : i32 to index
      %166 = memref.load %arg5[%165] : memref<2304xf32, #tpu.memory_space<smem>>
      %167 = vector.broadcast %166 : f32 to vector<8x8xf32>
      %168 = arith.mulf %167, %65 : vector<8x8xf32>
      %c5_i32_42 = arith.constant 5 : i32
      %169 = arith.addi %143, %c5_i32_42 : i32
      %170 = arith.index_cast %169 : i32 to index
      %171 = memref.load %arg5[%170] : memref<2304xf32, #tpu.memory_space<smem>>
      %172 = vector.broadcast %171 : f32 to vector<8x8xf32>
      %173 = arith.mulf %172, %66 : vector<8x8xf32>
      %c6_i32_43 = arith.constant 6 : i32
      %174 = arith.addi %143, %c6_i32_43 : i32
      %175 = arith.index_cast %174 : i32 to index
      %176 = memref.load %arg5[%175] : memref<2304xf32, #tpu.memory_space<smem>>
      %177 = vector.broadcast %176 : f32 to vector<8x8xf32>
      %178 = arith.mulf %177, %67 : vector<8x8xf32>
      %c7_i32_44 = arith.constant 7 : i32
      %179 = arith.addi %143, %c7_i32_44 : i32
      %180 = arith.index_cast %179 : i32 to index
      %181 = memref.load %arg5[%180] : memref<2304xf32, #tpu.memory_space<smem>>
      %182 = vector.broadcast %181 : f32 to vector<8x8xf32>
      %183 = arith.mulf %182, %68 : vector<8x8xf32>
      %c8_i32_45 = arith.constant 8 : i32
      %184 = arith.addi %143, %c8_i32_45 : i32
      %185 = arith.index_cast %184 : i32 to index
      %186 = memref.load %arg5[%185] : memref<2304xf32, #tpu.memory_space<smem>>
      %187 = vector.broadcast %186 : f32 to vector<8x8xf32>
      %188 = arith.mulf %187, %69 : vector<8x8xf32>
      %189 = arith.addf %148, %153 : vector<8x8xf32>
      %190 = arith.addf %158, %163 : vector<8x8xf32>
      %191 = arith.addf %168, %173 : vector<8x8xf32>
      %192 = arith.addf %178, %183 : vector<8x8xf32>
      %193 = arith.addf %189, %190 : vector<8x8xf32>
      %194 = arith.addf %191, %192 : vector<8x8xf32>
      %195 = arith.addf %193, %194 : vector<8x8xf32>
      %196 = arith.addf %195, %188 : vector<8x8xf32>
      %197 = arith.index_cast %142 : i32 to index
      %198 = memref.load %arg6[%197] : memref<256xf32, #tpu.memory_space<smem>>
      %199 = vector.broadcast %198 : f32 to vector<8x8xf32>
      %200 = arith.addf %196, %199 : vector<8x8xf32>
      %cst_46 = arith.constant 0.000000e+00 : f32
      %201 = vector.broadcast %cst_46 : f32 to vector<8x8xf32>
      %202 = arith.maximumf %200, %201 : vector<8x8xf32>
      %c0_47 = arith.constant 0 : index
      %203 = arith.index_cast %140 : i32 to index
      %c0_48 = arith.constant 0 : index
      %c0_49 = arith.constant 0 : index
      %204 = vector.load %arg7[%c0_47, %203, %c0_48, %c0_49] : memref<1x128x8x8xf32, #tpu.memory_space<vmem>>, vector<1x1x8x8xf32>
      %205 = vector.shape_cast %204 : vector<1x1x8x8xf32> to vector<8x8xf32>
      %206 = vector.shape_cast %202 : vector<8x8xf32> to vector<1x1x8x8xf32>
      tpu.vector_store %arg7[%c0_47, %203, %c0_48, %c0_49], %206 {strides = array<i32>} : memref<1x128x8x8xf32, #tpu.memory_space<vmem>>, vector<1x1x8x8xf32>,
      %c4_i32_50 = arith.constant 4 : i32
      %207 = arith.muli %arg9, %c4_i32_50 : i32
      %c2_i32_51 = arith.constant 2 : i32
      %208 = arith.addi %207, %c2_i32_51 : i32
      %c128_i32_52 = arith.constant 128 : i32
      %209 = arith.muli %arg1, %c128_i32_52 : i32
      %210 = arith.addi %209, %208 : i32
      %c9_i32_53 = arith.constant 9 : i32
      %211 = arith.muli %210, %c9_i32_53 : i32
      %c0_i32_54 = arith.constant 0 : i32
      %212 = arith.addi %211, %c0_i32_54 : i32
      %213 = arith.index_cast %212 : i32 to index
      %214 = memref.load %arg5[%213] : memref<2304xf32, #tpu.memory_space<smem>>
      %215 = vector.broadcast %214 : f32 to vector<8x8xf32>
      %216 = arith.mulf %215, %61 : vector<8x8xf32>
      %c1_i32_55 = arith.constant 1 : i32
      %217 = arith.addi %211, %c1_i32_55 : i32
      %218 = arith.index_cast %217 : i32 to index
      %219 = memref.load %arg5[%218] : memref<2304xf32, #tpu.memory_space<smem>>
      %220 = vector.broadcast %219 : f32 to vector<8x8xf32>
      %221 = arith.mulf %220, %62 : vector<8x8xf32>
      %c2_i32_56 = arith.constant 2 : i32
      %222 = arith.addi %211, %c2_i32_56 : i32
      %223 = arith.index_cast %222 : i32 to index
      %224 = memref.load %arg5[%223] : memref<2304xf32, #tpu.memory_space<smem>>
      %225 = vector.broadcast %224 : f32 to vector<8x8xf32>
      %226 = arith.mulf %225, %63 : vector<8x8xf32>
      %c3_i32_57 = arith.constant 3 : i32
      %227 = arith.addi %211, %c3_i32_57 : i32
      %228 = arith.index_cast %227 : i32 to index
      %229 = memref.load %arg5[%228] : memref<2304xf32, #tpu.memory_space<smem>>
      %230 = vector.broadcast %229 : f32 to vector<8x8xf32>
      %231 = arith.mulf %230, %64 : vector<8x8xf32>
      %c4_i32_58 = arith.constant 4 : i32
      %232 = arith.addi %211, %c4_i32_58 : i32
      %233 = arith.index_cast %232 : i32 to index
      %234 = memref.load %arg5[%233] : memref<2304xf32, #tpu.memory_space<smem>>
      %235 = vector.broadcast %234 : f32 to vector<8x8xf32>
      %236 = arith.mulf %235, %65 : vector<8x8xf32>
      %c5_i32_59 = arith.constant 5 : i32
      %237 = arith.addi %211, %c5_i32_59 : i32
      %238 = arith.index_cast %237 : i32 to index
      %239 = memref.load %arg5[%238] : memref<2304xf32, #tpu.memory_space<smem>>
      %240 = vector.broadcast %239 : f32 to vector<8x8xf32>
      %241 = arith.mulf %240, %66 : vector<8x8xf32>
      %c6_i32_60 = arith.constant 6 : i32
      %242 = arith.addi %211, %c6_i32_60 : i32
      %243 = arith.index_cast %242 : i32 to index
      %244 = memref.load %arg5[%243] : memref<2304xf32, #tpu.memory_space<smem>>
      %245 = vector.broadcast %244 : f32 to vector<8x8xf32>
      %246 = arith.mulf %245, %67 : vector<8x8xf32>
      %c7_i32_61 = arith.constant 7 : i32
      %247 = arith.addi %211, %c7_i32_61 : i32
      %248 = arith.index_cast %247 : i32 to index
      %249 = memref.load %arg5[%248] : memref<2304xf32, #tpu.memory_space<smem>>
      %250 = vector.broadcast %249 : f32 to vector<8x8xf32>
      %251 = arith.mulf %250, %68 : vector<8x8xf32>
      %c8_i32_62 = arith.constant 8 : i32
      %252 = arith.addi %211, %c8_i32_62 : i32
      %253 = arith.index_cast %252 : i32 to index
      %254 = memref.load %arg5[%253] : memref<2304xf32, #tpu.memory_space<smem>>
      %255 = vector.broadcast %254 : f32 to vector<8x8xf32>
      %256 = arith.mulf %255, %69 : vector<8x8xf32>
      %257 = arith.addf %216, %221 : vector<8x8xf32>
      %258 = arith.addf %226, %231 : vector<8x8xf32>
      %259 = arith.addf %236, %241 : vector<8x8xf32>
      %260 = arith.addf %246, %251 : vector<8x8xf32>
      %261 = arith.addf %257, %258 : vector<8x8xf32>
      %262 = arith.addf %259, %260 : vector<8x8xf32>
      %263 = arith.addf %261, %262 : vector<8x8xf32>
      %264 = arith.addf %263, %256 : vector<8x8xf32>
      %265 = arith.index_cast %210 : i32 to index
      %266 = memref.load %arg6[%265] : memref<256xf32, #tpu.memory_space<smem>>
      %267 = vector.broadcast %266 : f32 to vector<8x8xf32>
      %268 = arith.addf %264, %267 : vector<8x8xf32>
      %cst_63 = arith.constant 0.000000e+00 : f32
      %269 = vector.broadcast %cst_63 : f32 to vector<8x8xf32>
      %270 = arith.maximumf %268, %269 : vector<8x8xf32>
      %c0_64 = arith.constant 0 : index
      %271 = arith.index_cast %208 : i32 to index
      %c0_65 = arith.constant 0 : index
      %c0_66 = arith.constant 0 : index
      %272 = vector.load %arg7[%c0_64, %271, %c0_65, %c0_66] : memref<1x128x8x8xf32, #tpu.memory_space<vmem>>, vector<1x1x8x8xf32>
      %273 = vector.shape_cast %272 : vector<1x1x8x8xf32> to vector<8x8xf32>
      %274 = vector.shape_cast %270 : vector<8x8xf32> to vector<1x1x8x8xf32>
      tpu.vector_store %arg7[%c0_64, %271, %c0_65, %c0_66], %274 {strides = array<i32>} : memref<1x128x8x8xf32, #tpu.memory_space<vmem>>, vector<1x1x8x8xf32>,
      %c4_i32_67 = arith.constant 4 : i32
      %275 = arith.muli %arg9, %c4_i32_67 : i32
      %c3_i32_68 = arith.constant 3 : i32
      %276 = arith.addi %275, %c3_i32_68 : i32
      %c128_i32_69 = arith.constant 128 : i32
      %277 = arith.muli %arg1, %c128_i32_69 : i32
      %278 = arith.addi %277, %276 : i32
      %c9_i32_70 = arith.constant 9 : i32
      %279 = arith.muli %278, %c9_i32_70 : i32
      %c0_i32_71 = arith.constant 0 : i32
      %280 = arith.addi %279, %c0_i32_71 : i32
      %281 = arith.index_cast %280 : i32 to index
      %282 = memref.load %arg5[%281] : memref<2304xf32, #tpu.memory_space<smem>>
      %283 = vector.broadcast %282 : f32 to vector<8x8xf32>
      %284 = arith.mulf %283, %61 : vector<8x8xf32>
      %c1_i32_72 = arith.constant 1 : i32
      %285 = arith.addi %279, %c1_i32_72 : i32
      %286 = arith.index_cast %285 : i32 to index
      %287 = memref.load %arg5[%286] : memref<2304xf32, #tpu.memory_space<smem>>
      %288 = vector.broadcast %287 : f32 to vector<8x8xf32>
      %289 = arith.mulf %288, %62 : vector<8x8xf32>
      %c2_i32_73 = arith.constant 2 : i32
      %290 = arith.addi %279, %c2_i32_73 : i32
      %291 = arith.index_cast %290 : i32 to index
      %292 = memref.load %arg5[%291] : memref<2304xf32, #tpu.memory_space<smem>>
      %293 = vector.broadcast %292 : f32 to vector<8x8xf32>
      %294 = arith.mulf %293, %63 : vector<8x8xf32>
      %c3_i32_74 = arith.constant 3 : i32
      %295 = arith.addi %279, %c3_i32_74 : i32
      %296 = arith.index_cast %295 : i32 to index
      %297 = memref.load %arg5[%296] : memref<2304xf32, #tpu.memory_space<smem>>
      %298 = vector.broadcast %297 : f32 to vector<8x8xf32>
      %299 = arith.mulf %298, %64 : vector<8x8xf32>
      %c4_i32_75 = arith.constant 4 : i32
      %300 = arith.addi %279, %c4_i32_75 : i32
      %301 = arith.index_cast %300 : i32 to index
      %302 = memref.load %arg5[%301] : memref<2304xf32, #tpu.memory_space<smem>>
      %303 = vector.broadcast %302 : f32 to vector<8x8xf32>
      %304 = arith.mulf %303, %65 : vector<8x8xf32>
      %c5_i32_76 = arith.constant 5 : i32
      %305 = arith.addi %279, %c5_i32_76 : i32
      %306 = arith.index_cast %305 : i32 to index
      %307 = memref.load %arg5[%306] : memref<2304xf32, #tpu.memory_space<smem>>
      %308 = vector.broadcast %307 : f32 to vector<8x8xf32>
      %309 = arith.mulf %308, %66 : vector<8x8xf32>
      %c6_i32_77 = arith.constant 6 : i32
      %310 = arith.addi %279, %c6_i32_77 : i32
      %311 = arith.index_cast %310 : i32 to index
      %312 = memref.load %arg5[%311] : memref<2304xf32, #tpu.memory_space<smem>>
      %313 = vector.broadcast %312 : f32 to vector<8x8xf32>
      %314 = arith.mulf %313, %67 : vector<8x8xf32>
      %c7_i32_78 = arith.constant 7 : i32
      %315 = arith.addi %279, %c7_i32_78 : i32
      %316 = arith.index_cast %315 : i32 to index
      %317 = memref.load %arg5[%316] : memref<2304xf32, #tpu.memory_space<smem>>
      %318 = vector.broadcast %317 : f32 to vector<8x8xf32>
      %319 = arith.mulf %318, %68 : vector<8x8xf32>
      %c8_i32_79 = arith.constant 8 : i32
      %320 = arith.addi %279, %c8_i32_79 : i32
      %321 = arith.index_cast %320 : i32 to index
      %322 = memref.load %arg5[%321] : memref<2304xf32, #tpu.memory_space<smem>>
      %323 = vector.broadcast %322 : f32 to vector<8x8xf32>
      %324 = arith.mulf %323, %69 : vector<8x8xf32>
      %325 = arith.addf %284, %289 : vector<8x8xf32>
      %326 = arith.addf %294, %299 : vector<8x8xf32>
      %327 = arith.addf %304, %309 : vector<8x8xf32>
      %328 = arith.addf %314, %319 : vector<8x8xf32>
      %329 = arith.addf %325, %326 : vector<8x8xf32>
      %330 = arith.addf %327, %328 : vector<8x8xf32>
      %331 = arith.addf %329, %330 : vector<8x8xf32>
      %332 = arith.addf %331, %324 : vector<8x8xf32>
      %333 = arith.index_cast %278 : i32 to index
      %334 = memref.load %arg6[%333] : memref<256xf32, #tpu.memory_space<smem>>
      %335 = vector.broadcast %334 : f32 to vector<8x8xf32>
      %336 = arith.addf %332, %335 : vector<8x8xf32>
      %cst_80 = arith.constant 0.000000e+00 : f32
      %337 = vector.broadcast %cst_80 : f32 to vector<8x8xf32>
      %338 = arith.maximumf %336, %337 : vector<8x8xf32>
      %c0_81 = arith.constant 0 : index
      %339 = arith.index_cast %276 : i32 to index
      %c0_82 = arith.constant 0 : index
      %c0_83 = arith.constant 0 : index
      %340 = vector.load %arg7[%c0_81, %339, %c0_82, %c0_83] : memref<1x128x8x8xf32, #tpu.memory_space<vmem>>, vector<1x1x8x8xf32>
      %341 = vector.shape_cast %340 : vector<1x1x8x8xf32> to vector<8x8xf32>
      %342 = vector.shape_cast %338 : vector<8x8xf32> to vector<1x1x8x8xf32>
      tpu.vector_store %arg7[%c0_81, %339, %c0_82, %c0_83], %342 {strides = array<i32>} : memref<1x128x8x8xf32, #tpu.memory_space<vmem>>, vector<1x1x8x8xf32>,
    }
    %c32_i32_24 = arith.constant 32 : i32
    return
  }
  func.func @transform_0(%arg0: i32, %arg1: i32) -> (i32, i32, i32, i32) {
    %c0_i32 = arith.constant 0 : i32
    %c0_i32_0 = arith.constant 0 : i32
    %c0_i32_1 = arith.constant 0 : i32
    %c0_i32_2 = arith.constant 0 : i32
    return %arg0, %c0_i32, %c0_i32_0, %c0_i32_1 : i32, i32, i32, i32
  }
  func.func @transform_1(%arg0: i32, %arg1: i32) -> i32 {
    %c0_i32 = arith.constant 0 : i32
    %c0_i32_0 = arith.constant 0 : i32
    return %c0_i32 : i32
  }
  func.func @transform_2(%arg0: i32, %arg1: i32) -> i32 {
    %c0_i32 = arith.constant 0 : i32
    %c0_i32_0 = arith.constant 0 : i32
    return %c0_i32 : i32
  }
  func.func @transform_3(%arg0: i32, %arg1: i32) -> i32 {
    %c0_i32 = arith.constant 0 : i32
    %c0_i32_0 = arith.constant 0 : i32
    return %c0_i32 : i32
  }
  func.func @transform_4(%arg0: i32, %arg1: i32) -> i32 {
    %c0_i32 = arith.constant 0 : i32
    %c0_i32_0 = arith.constant 0 : i32
    return %c0_i32 : i32
  }
  func.func @transform_5(%arg0: i32, %arg1: i32) -> (i32, i32, i32, i32) {
    %c0_i32 = arith.constant 0 : i32
    %c0_i32_0 = arith.constant 0 : i32
    %c0_i32_1 = arith.constant 0 : i32
    return %arg0, %arg1, %c0_i32, %c0_i32_0 : i32, i32, i32, i32
  }
}

</mosaic_0001>

<bundles_post_ra>
// kernel: simple_resize_cnn_forward.1
= control target key start
LH: loop header
LB: loop body
LE: loop exit
PB: predicated region body
PF: predicated region fallthrough
CT: control target
= control target key end

     0   :  { %s1707_s0 = inlined_call_operand.vmem [shape: f32[2,4,9,9], index: 0, kind: input, shape index: {}]   ;;  %s1708_s1 = inlined_call_operand.vmem [shape: f32[9], index: 1, kind: input, shape index: {}]   ;;  %s1709_s2 = inlined_call_operand.<no memory space> [shape: f32[1], index: 2, kind: input, shape index: {}]   ;;  %s1710_s3 = inlined_call_operand.vmem [shape: f32[2304], index: 3, kind: input, shape index: {}]   ;;  %s1711_s4 = inlined_call_operand.hbm [shape: f32[256], index: 4, kind: input, shape index: {}]   ;;  %s1712_s5 = inlined_call_operand.vmem [shape: f32[2,256,8,8], index: 5, kind: output, shape index: {}]  }
   0x1   :  { %1722 = sst [smem:[#allocation13_spill]] %s1707_s0 }
   0x2   :  { %1723 = sst [smem:[#allocation14_spill]] %s1708_s1 }
   0x3   :  { %1724 = sst [smem:[#allocation15_spill]] %s1710_s3 }
   0x4   :  { %10 = sst [smem:[#allocation3]] %s1709_s2 }
   0x5   :  { %11 = vsyncpa [#allocation6], 0 }
   0x6   :  { %12 = vsyncpa [#allocation8], 0 }
   0x7   :  { %13 = vsyncpa [#allocation5], 0  ;;  %s1287_s20 = smov 0   ;;  %s1289_s21 = smov 0  }
   0x8   :  { %s1291_s22 = smov 0   ;;  %s1293_s23 = smov 0  }
   0x9   :  { %s1295_s24 = smov 0  }
   0xa LB: > { %s1008_s2 = sadd.s32 4294967295, %s1238_s24   ;;  %s28_s25 = sadd.s32 1, %s1230_s22  ;;  %s1238_s24 = sphi %s1295_s24, %s19_s24   ;;  %s1234_s23 = sphi %s1293_s23, %s1739_s23   ;;  %s1230_s22 = sphi %s1291_s22, %s1738_s22   ;;  %s1226_s21 = sphi %s1289_s21, %s1737_s21   ;;  %s1222_s20 = sphi %s1287_s20, %s1736_s20  }
   0xb   : > { %p29_p0 = scmp.ge.s32.totalorder %s28_s25, 2  ;;  %s31_s26 = sadd.s32 1, %s1234_s23 }
   0xc   : > { %p1010_p1 = scmp.ge.s32.totalorder %s1238_s24, 1  ;;  %p174_p2 = scmp.lt.s32.totalorder %s1238_s24, 5 }
   0xd   : > { %s1741_s25 = smov (%p29_p0, %s28_s25), 0  ;;  %s1743_s26 = smov (!%p29_p0, %s31_s26), %s1234_s23 }
   0xe   : > { %p1320_p3 = pnand %p1010_p1, %p174_p2  ;;  %p33_p4 = scmp.ge.s32.totalorder %s1743_s26, 2 }
   0xf   : > { %p1324_p5 = scmp.eq.s32.totalorder %s1008_s2, 0  ;;  %s1727_s1 = sld [smem:[#allocation14_spill]] }
  0x10   : > { %s1725_s27 = scalar_select %p1320_p3, 1, 0 }
  0x11   : > { %s1726_s28 = scalar_select %p1324_p5, 1, 0 }
  0x12   : > { %p1067_p6 = pneg %p1320_p3  ;;  %s1745_s26 = smov (%p33_p4, %s1743_s26), 0 }
  0x13   : > { %s1729_s3 = sld [smem:[#allocation15_spill]] }
  0x14   : > { %p1337_p7 = pnand %p1324_p5, %p1067_p6 }
  0x15   : > { %s187_s6 = sshll.u32 %s1727_s1, 4  ;;  %s188_s6 = int_to_ptr.vmem [resolvable:$true] %s187_s6 }
  0x16   : > { %s1141_s11 = scalar_lea.vmem %s188_s6, 16  ;;  %p1143_p9 = pneg %p1337_p7 }
  0x17   : > { %p1142_p8 = scmp.ne.s32.totalorder %s188_s6, %s1141_s11  ;;  %p1149_p12 = scmp.lt.s32.totalorder %s188_s6, %s188_s6 }
  0x18   : > { %p1150_p13 = scmp.lt.s32.totalorder %s1141_s11, %s1141_s11 }
  0x19   : > { %s201_s10 = sshll.u32 %s1729_s3, 4  ;;  %p1144_p10 = pnand %p1143_p9, %p1142_p8  ;;  %s202_s10 = int_to_ptr.vmem [resolvable:$true] %s201_s10 }
  0x1a   : > { %p1151_p0 = por %p1150_p13, %p1149_p12 }
  0x1b   : > { %p1145_p11 = pneg %p1144_p10 }
  0x1d   : > { %p1152_p1 = pnand %p1151_p0, %p1145_p11 }
  0x1f   : > { %1155 = shalt.err (!%p1152_p1)
}
  0x20   : > { %s1244_s12 = smov [#allocation4]   ;;  %s1156_s13 = scalar_lea.vmem %s202_s10, 288 }
  0x21   : > { %1070 = dma.vmem_to_smem (!%p1337_p7), %s188_s6, 16, %s1244_s12, [#allocation6]  }
  0x22   : > { %p1157_p2 = scmp.ne.s32.totalorder %s202_s10, %s1156_s13  ;;  %s1163_s14 = scalar_lea.vmem %s202_s10, 384 }
  0x23   : > { %p1164_p5 = scmp.lt.s32.totalorder %s202_s10, %s202_s10  ;;  %p1165_p8 = scmp.lt.s32.totalorder %s1163_s14, %s1156_s13 }
  0x24   : > { %p1159_p4 = pnand %p1157_p2, %p1143_p9 }
  0x25   : > { %p1166_p10 = por %p1165_p8, %p1164_p5 }
  0x26   : > { %p1160_p6 = pneg %p1159_p4 }
  0x28   : > { %p1167_p3 = pnand %p1166_p10, %p1160_p6 }
  0x2a   : > { %1170 = shalt.err (!%p1167_p3)
}
  0x2b   : > { %s1245_s15 = smov [#allocation7]   ;;  %s1171_s18 = scalar_lea.hbm %s1711_s4, 32 }
  0x2c   : > { %1073 = dma.vmem_to_smem (!%p1337_p7), %s202_s10, 288, %s1245_s15, [#allocation8]  }
  0x2d   : > { %p1172_p11 = scmp.ne.s32.totalorder %s1711_s4, %s1171_s18  ;;  %p1178_p3 = scmp.lt.u32.totalorder %s1171_s18, %s1711_s4 }
  0x2f   : > { %p1174_p12 = pnand %p1172_p11, %p1143_p9 }
  0x31   : > { %p1175_p13 = pneg %p1174_p12 }
  0x33   : > { %p1180_p5 = pnand %p1178_p3, %p1175_p13 }
  0x35   : > { %1183 = shalt.err (!%p1180_p5)
}
  0x36   : > { %s1246_s6 = smov [#allocation9]   ;;  %p1730_p0 = scmp.ne.s32.totalorder %s1725_s27, 0 }
  0x37   : > { %1076 = dma.hbm_to_smem (!%p1337_p7), %s1711_s4, 32, %s1246_s6, [#allocation5]  }
  0x38   : > { %231 = sbr.rel (%p1730_p0) target bundleno = 852 (0x354), region = 40  ;;  %p1731_p1 = scmp.ne.s32.totalorder (!%p1730_p0), %s1726_s28, 0 }
  0x3f   : > { %1209 = dma.done.wait (%p1731_p1), [#allocation6], 16  }
  0x40   : > { %1211 = vsyncadd (%p1731_p1), [#allocation6], 4294967280 }
  0x41   : > { %1213 = dma.done.wait (%p1731_p1), [#allocation8], 288  }
  0x42   : > { %1215 = vsyncadd (%p1731_p1), [#allocation8], 4294967008 }
  0x43   : > { %1217 = dma.done.wait (%p1731_p1), [#allocation5], 32  }
  0x44   : > { %1219 = vsyncadd (%p1731_p1), [#allocation5], 4294967264 }
  0x45   : > { %245 = sfence }
  0x46   : > { %p272_p7 = scmp.lt.s32.totalorder %s1226_s21, 1  ;;  %s1389_s27 = sshll.u32 %s1222_s20, 7  ;;  %vm346_vm0 = vcmask 1046528   ;;  %vm366_vm1 = vcmask 80896   ;;  %vm368_vm2 = vcmask 74752   ;;  %v1249_v31 = vmov 0.0  }
  0x47   : > { %p280_p9 = scmp.lt.s32.totalorder %s1389_s27, 255  ;;  %s1030_s7 = sld [smem:[#allocation4 + $0x3]]  ;;  %367 = vst.msk [vmem:[#allocation2] sm:$0xff] %vm366_vm1, %v1249_v31  ;;  %vm374_vm3 = vcmask 72712  }
  0x48   : > { %s1747_s21 = smov (!%p272_p7, %s1226_s21), 1  ;;  %s1732_s0 = sld [smem:[#allocation13_spill]]  ;;  %369 = vst.msk [vmem:[#allocation2 + $0x8] sm:$0x3] %vm368_vm2, %v1249_v31 }
  0x49   : > { %s281_s10 = scalar_select %p280_p9, %s1389_s27, 255 }
  0x4a   : > { %s1050_s11 = sshll.u32 %s1747_s21, 6  ;;  %s1022_s12 = sshll.u32 %s1747_s21, 8 }
  0x4b   : > { %s283_s15 = sadd.s32 %s1022_s12, %s281_s10  ;;  %s1032_s20 = sld [smem:[#allocation4 + $0x5]] }
  0x4c   : > { %s1023_s16 = sshll.u32 %s283_s15, 3  ;;  %s1033_s21 = sld [smem:[#allocation4 + $0x6]] }
  0x4d   : > { %s1403_s19 = scalar_lea.vmem %s1712_s5, %s1023_s16  ;;  %v306_v1 = vstv %s1030_s7  ;;  %s1247_s2 = smov 1  }
  0x4e   : > { %s1397_s28 = scalar_lea.vmem %s1732_s0, %s1050_s11  ;;  %s1034_s29 = sld [smem:[#allocation4 + $0x7]] }
  0x4f   : > { %v1026_v0 = vld [vmem:[%s1397_s28 + $0x20] sm:$0xff]  ;;  %v288_v5 = vld [vmem:[%s1397_s28 + $0x8] sm:$0x1]  ;;  %s1248_s30 = smov 127   ;;  %v1024_v7 = vld [vmem:[%s1397_s28 + $0x10] sm:$0xff]  ;;  %s1035_s6 = sld [smem:[#allocation4 + $0x8]] }
  0x50   : > { %v307_v2 = vmul.f32 %v1026_v0, %v306_v1  ;;  %v1025_v8 = vld [vmem:[%s1397_s28 + $0x18] sm:$0x1]  ;;  %v287_v9 = vld [vmem:[%s1397_s28] sm:$0xff]  ;;  %s1029_s8 = sld [smem:[#allocation4 + $0x2]]  ;;  %s1031_s9 = sld [smem:[#allocation4 + $0x4]]  ;;  %v1027_v26 = vld [vmem:[%s1397_s28 + $0x30] sm:$0xff] }
  0x51   : > { %v312_v3 = vstv %s1032_s20  ;;  %s296_s7 = sld [smem:[#allocation4]]  ;;  %s1028_s10 = sld [smem:[#allocation4 + $0x1]] }
  0x52   : > { %328 = vrot.lane.b32.xlu0 %v307_v2, %s1247_s2  ;;  %v313_v4 = vmul.f32 %v1026_v0, %v312_v3  ;;  %v315_v6 = vstv %s1033_s21  ;;  %s362_s11 = sld [smem:[#allocation3]]  ;;  %s1421_s12 = smov 0  }
  0x53   : > { %v317_v10 = vmul.f32 %v315_v6, %v288_v5  ;;  %v316_v12 = vmul.f32 %v315_v6, %v287_v9 }
  0x54   : > { %v319_v11 = vstv %s1034_s29 }
  0x55   : > { %v320_v13 = vmul.f32 %v1024_v7, %v319_v11  ;;  %v321_v14 = vmul.f32 %v1025_v8, %v319_v11  ;;  %v323_v20 = vstv %s1035_s6 }
  0x56   : > { %333 = vrot.lane.b32.xlu0 %v313_v4, %s1248_s30  ;;  %v303_v21 = vstv %s1029_s8  ;;  %v324_v22 = vmul.f32 %v323_v20, %v287_v9  ;;  %v325_v23 = vmul.f32 %v323_v20, %v288_v5  ;;  %v309_v27 = vstv %s1031_s9 }
  0x57   : > { %v337_v15 = vadd.f32 %v320_v13, %v316_v12  ;;  %v338_v16 = vadd.f32 %v321_v14, %v317_v10  ;;  %v304_v24 = vmul.f32 %v303_v21, %v287_v9  ;;  %v310_v32 = vmul.f32 %v1027_v26, %v309_v27 }
  0x58   : > { %v355_v25 = vrot.slane %v324_v22, 1  ;;  %v356_v29 = vrot.slane %v325_v23, 1  ;;  %v297_v37 = vstv %s296_s7  ;;  %v300_v38 = vstv %s1028_s10 }
  0x59   : > { %v347_v17 = vrot.slane %v337_v15, 1  ;;  %v348_v18 = vrot.slane %v338_v16, 1  ;;  %v301_v39 = vmul.f32 %v1024_v7, %v300_v38  ;;  %v298_v40 = vmul.f32 %v297_v37, %v287_v9 }
  0x5a   : > { %v357_v33 = vsel %vm346_vm0, %v355_v25, %v356_v29  ;;  %v363_v45 = vstv %s362_s11 }
  0x5b   : > { %v349_v19 = vsel %vm346_vm0, %v347_v17, %v348_v18  ;;  %v326_v41 = vadd.f32 %v301_v39, %v298_v40 }
  0xc4   : > { %v329_v28 = vpop.permute.xlu0 %328 }
  0xc5   : > { %v331_v30 = vadd.f32 %v329_v28, %v304_v24 }
  0xc7   : > { %340 = vrot.lane.b32.xlu1 %v331_v30, %s1248_s30 }
  0xc8   : > { %v334_v34 = vpop.permute.xlu0 %333 }
  0xc9   : > { %v336_v35 = vadd.f32 %v334_v34, %v310_v32 }
  0xcb   : > { %358 = vrot.lane.b32.xlu1 %v357_v33, %s1248_s30  ;;  %v351_v36 = vadd.f32 %v349_v19, %v336_v35 }
 0x139   : > { %v341_v42 = vpop.permute.xlu1 %340 }
 0x13a   : > { %v343_v43 = vadd.f32 %v341_v42, %v326_v41 }
 0x13c   : > { %v352_v44 = vadd.f32 %v351_v36, %v343_v43 }
 0x13d   : > { %v359_v46 = vpop.permute.xlu1 %358 }
 0x13e   : > { %v361_v47 = vadd.f32 %v359_v46, %v352_v44 }
 0x140   : > { %v364_v48 = vadd.f32 %v363_v45, %v361_v47 }
 0x142   : > { %v365_v49 = vmax.f32 %v364_v48, 0.0 }
 0x144   : > { %371 = vrot.lane.b32.xlu0 %v365_v49, %s1247_s2 }
 0x1b6   : > { %v372_v50 = vpop.permute.xlu0 %371 }
 0x1b7   : > { %375 = vst.msk [vmem:[#allocation2 + $0x1] sm:$0xff] %vm374_vm3, %v372_v50 }
 0x1be   : > { %v1417_v51 = vld [vmem:[#allocation2] sm:$0xff]  ;;  %v1419_v52 = vld [vmem:[#allocation2 + $0x8] sm:$0x3] }
 0x1bf LB: >> { %s1036_s13 = sshll.u32 %s1242_s12, 2  ;;  %s1733_s3 = smov 1   ;;  %vm492_vm4 = vcmask 1045504   ;;  %vm506_vm5 = vcmask 64512   ;;  %s1242_s12 = sphi %s1421_s12, %s383_s12  }
 0x1c0   : >> { %s1428_s14 = sadd.s32 %s1036_s13, %s1389_s27  ;;  %s508_s28 = sadd.s32 1, %s1036_s13 }
 0x1c1   : >> { %s1431_s15 = smul.u32 9, %s1428_s14  ;;  %s1434_s16 = sadd.s32 %s1389_s27, %s508_s28 }
 0x1c2   : >> { %s1437_s20 = smul.u32 9, %s1434_s16  ;;  %s629_s17 = sadd.s32 2, %s1036_s13 }
 0x1c3   : >> { %s419_s18 = sadd.s32 7, %s1431_s15  ;;  %s1441_s21 = sadd.s32 %s1389_s27, %s629_s17 }
 0x1c4   : >> { %s420_s2 = sld [smem:[#allocation7 + %s419_s18]]  ;;  %s542_s29 = sadd.s32 7, %s1437_s20 }
 0x1c5   : >> { %s543_s30 = sld [smem:[#allocation7 + %s542_s29]]  ;;  %s1445_s6 = smul.u32 9, %s1441_s21 }
 0x1c6   : >> { %s750_s8 = sadd.s32 3, %s1036_s13  ;;  %s409_s18 = sadd.s32 5, %s1431_s15 }
 0x1c7   : >> { %s663_s9 = sadd.s32 7, %s1445_s6  ;;  %s1449_s7 = sadd.s32 %s1389_s27, %s750_s8 }
 0x1c8   : >> { %s664_s10 = sld [smem:[#allocation7 + %s663_s9]]  ;;  %s1452_s11 = smul.u32 9, %s1449_s7 }
 0x1c9   : >> { %s1716_s13 = smov 127   ;;  %s532_s29 = sadd.s32 5, %s1437_s20 }
 0x1ca   : >> { %v421_v53 = vstv %s420_s2  ;;  %s784_s28 = sadd.s32 7, %s1452_s11  ;;  %s410_s2 = sld [smem:[#allocation7 + %s409_s18]] }
 0x1cb   : >> { %v422_v54 = vmul.f32 %v421_v53, %v1417_v51  ;;  %v544_v55 = vstv %s543_s30  ;;  %s785_s17 = sld [smem:[#allocation7 + %s784_s28]]  ;;  %v423_v57 = vmul.f32 %v421_v53, %v1419_v52  ;;  %s653_s8 = sadd.s32 5, %s1445_s6 }
 0x1cc   : >> { %v545_v56 = vmul.f32 %v544_v55, %v1417_v51  ;;  %v546_v58 = vmul.f32 %v544_v55, %v1419_v52  ;;  %s533_s30 = sld [smem:[#allocation7 + %s532_s29]]  ;;  %s399_s9 = sadd.s32 3, %s1431_s15 }
 0x1cd   : >> { %455 = vrot.lane.b32.xlu0 %v422_v54, %s1716_s13  ;;  %s654_s28 = sld [smem:[#allocation7 + %s653_s8]]  ;;  %s774_s18 = sadd.s32 5, %s1452_s11 }
 0x1ce   : >> { %578 = vrot.lane.b32.xlu1 %v545_v56, %s1716_s13  ;;  %v665_v59 = vstv %s664_s10  ;;  %s522_s10 = sadd.s32 3, %s1437_s20  ;;  %s400_s0 = sld [smem:[#allocation7 + %s399_s9]] }
 0x1cf   : >> { %v666_v60 = vmul.f32 %v665_v59, %v1417_v51  ;;  %v667_v61 = vmul.f32 %v665_v59, %v1419_v52  ;;  %s523_s1 = sld [smem:[#allocation7 + %s522_s10]]  ;;  %s658_s8 = sadd.s32 6, %s1445_s6 }
 0x1d0   : >> { %v411_v1 = vstv %s410_s2  ;;  %s537_s2 = sadd.s32 6, %s1437_s20  ;;  %s659_s9 = sld [smem:[#allocation7 + %s658_s8]] }
 0x1d1   : >> { %457 = vrot.lane.b32.xlu0 %v423_v57, %s1716_s13  ;;  %v786_v62 = vstv %s785_s17  ;;  %v412_v2 = vmul.f32 %v411_v1, %v1417_v51  ;;  %v413_v3 = vmul.f32 %v411_v1, %v1419_v52  ;;  %s775_s17 = sld [smem:[#allocation7 + %s774_s18]]  ;;  %s779_s10 = sadd.s32 6, %s1452_s11 }
 0x1d2   : >> { %580 = vrot.lane.b32.xlu1 %v546_v58, %s1716_s13  ;;  %v787_v63 = vmul.f32 %v786_v62, %v1417_v51  ;;  %v788_v0 = vmul.f32 %v786_v62, %v1419_v52  ;;  %v534_v4 = vstv %s533_s30  ;;  %s538_s30 = sld [smem:[#allocation7 + %s537_s2]]  ;;  %s764_s18 = sadd.s32 3, %s1452_s11 }
 0x1d3   : >> { %v535_v5 = vmul.f32 %v534_v4, %v1417_v51  ;;  %v536_v6 = vmul.f32 %v534_v4, %v1419_v52  ;;  %v655_v7 = vstv %s654_s28  ;;  %s1505_s28 = sld [smem:[#allocation7 + %s779_s10]]  ;;  %s391_s8 = sadd.s32 1, %s1431_s15 }
 0x1d4   : >> { %v401_v8 = vstv %s400_s0  ;;  %v656_v10 = vmul.f32 %v655_v7, %v1417_v51  ;;  %v657_v11 = vmul.f32 %v655_v7, %v1419_v52  ;;  %s1718_s0 = smov 2  }
 0x1d5   : >> { %699 = vrot.lane.b32.xlu0 %v666_v60, %s1716_s13  ;;  %v524_v9 = vstv %s523_s1  ;;  %v402_v13 = vmul.f32 %v401_v8, %v1417_v51  ;;  %v403_v14 = vmul.f32 %v401_v8, %v1419_v52  ;;  %s414_s1 = sadd.s32 6, %s1431_s15 }
 0x1d6   : >> { %701 = vrot.lane.b32.xlu1 %v667_v61, %s1716_s13  ;;  %v525_v15 = vmul.f32 %v524_v9, %v1417_v51  ;;  %v526_v16 = vmul.f32 %v524_v9, %v1419_v52  ;;  %s415_s29 = sld [smem:[#allocation7 + %s414_s1]]  ;;  %v660_v33 = vstv %s659_s9  ;;  %s547_s9 = sadd.s32 8, %s1437_s20 }
 0x1d7   : >> { %v776_v12 = vstv %s775_s17  ;;  %v436_v19 = vrot.slane %v402_v13, 1  ;;  %v437_v20 = vrot.slane %v403_v14, 1  ;;  %s643_s17 = sadd.s32 3, %s1445_s6  ;;  %s1513_s1 = sld [smem:[#allocation7 + %s764_s18]]  ;;  %v661_v39 = vmul.f32 %v660_v33, %v1417_v51 }
 0x1d8   : >> { %v777_v17 = vmul.f32 %v776_v12, %v1417_v51  ;;  %v778_v18 = vmul.f32 %v776_v12, %v1419_v52  ;;  %v559_v21 = vrot.slane %v525_v15, 1  ;;  %v560_v22 = vrot.slane %v526_v16, 1  ;;  %s1515_s2 = sld [smem:[#allocation7 + %s643_s17]] }
 0x1d9   : >> { %820 = vrot.lane.b32.xlu0 %v787_v63, %s1716_s13  ;;  %v438_v23 = vsel %vm346_vm0, %v436_v19, %v437_v20  ;;  %v539_v26 = vstv %s538_s30  ;;  %v781_v40 = vstv %s1505_s28  ;;  %v662_v42 = vmul.f32 %v660_v33, %v1419_v52  ;;  %s514_s30 = sadd.s32 1, %s1437_s20  ;;  %s756_s28 = sadd.s32 1, %s1452_s11 }
 0x1da   : >> { %822 = vrot.lane.b32.xlu1 %v788_v0, %s1716_s13  ;;  %v561_v24 = vsel %vm346_vm0, %v559_v21, %v560_v22  ;;  %v540_v30 = vmul.f32 %v539_v26, %v1417_v51  ;;  %v541_v32 = vmul.f32 %v539_v26, %v1419_v52  ;;  %v782_v46 = vmul.f32 %v781_v40, %v1417_v51  ;;  %s1535_s10 = sld [smem:[#allocation7 + %s514_s30]]  ;;  %s424_s30 = sadd.s32 8, %s1431_s15 }
 0x1db   : >> { %v783_v55 = vmul.f32 %v781_v40, %v1419_v52  ;;  %s1541_s18 = sld [smem:[#allocation7 + %s391_s8]]  ;;  %s518_s8 = sadd.s32 2, %s1437_s20 }
 0x1dc   : >> { %v416_v25 = vstv %s415_s29  ;;  %s1720_s29 = smov 1   ;;  %s1543_s17 = sld [smem:[#allocation7 + %s547_s9]] }
 0x1dd   : >> { %445 = vrot.lane.b32.xlu0 %v412_v2, %s1716_s13  ;;  %v417_v27 = vmul.f32 %v416_v25, %v1417_v51  ;;  %v418_v31 = vmul.f32 %v416_v25, %v1419_v52  ;;  %v766_v57 = vstv %s1513_s1  ;;  %s635_s1 = sadd.s32 1, %s1445_s6 }
 0x1de   : >> { %447 = vrot.lane.b32.xlu1 %v413_v3, %s1716_s13  ;;  %v645_v60 = vstv %s1515_s2  ;;  %v767_v1 = vmul.f32 %v766_v57, %v1417_v51  ;;  %v768_v2 = vmul.f32 %v766_v57, %v1419_v52  ;;  %s395_s2 = sadd.s32 2, %s1431_s15  ;;  %s1558_s9 = sld [smem:[#allocation7 + %s635_s1]] }
 0x1df   : >> { %s1734_s1 = smov 2  }
 0x1e1   : >> { %568 = vrot.lane.b32.xlu0 %v535_v5, %s1716_s13  ;;  %v646_v5 = vmul.f32 %v645_v60, %v1417_v51  ;;  %v393_v20 = vstv %s1541_s18 }
 0x1e2   : >> { %570 = vrot.lane.b32.xlu1 %v536_v6, %s1716_s13  ;;  %v647_v6 = vmul.f32 %v645_v60, %v1419_v52  ;;  %v549_v21 = vstv %s1543_s17  ;;  %v394_v26 = vmul.f32 %v393_v20, %v1417_v51  ;;  %s648_s17 = sadd.s32 4, %s1445_s6 }
 0x1e3   : >> { %v680_v13 = vrot.slane %v646_v5, 1 }
 0x1e4   : >> { %v681_v14 = vrot.slane %v647_v6, 1 }
 0x1e5   : >> { %689 = vrot.lane.b32.xlu0 %v656_v10, %s1716_s13  ;;  %v801_v10 = vrot.slane %v767_v1, 1 }
 0x1e6   : >> { %691 = vrot.lane.b32.xlu1 %v657_v11, %s1716_s13  ;;  %v802_v11 = vrot.slane %v768_v2, 1  ;;  %v682_v19 = vsel %vm346_vm0, %v680_v13, %v681_v14 }
 0x1e9   : >> { %810 = vrot.lane.b32.xlu0 %v777_v17, %s1716_s13  ;;  %v803_v17 = vsel %vm346_vm0, %v801_v10, %v802_v11 }
 0x1ea   : >> { %812 = vrot.lane.b32.xlu1 %v778_v18, %s1716_s13  ;;  %s1554_s13 = sld [smem:[#allocation7 + %s756_s28]]  ;;  %v516_v18 = vstv %s1535_s10  ;;  %s527_s10 = sadd.s32 4, %s1437_s20 }
 0x1eb   : >> { %s1569_s28 = sld [smem:[#allocation7 + %s518_s8]] }
 0x1ec   : >> { %s528_s18 = sld [smem:[#allocation7 + %s527_s10]]  ;;  %s668_s10 = sadd.s32 8, %s1445_s6 }
 0x1ed   : >> { %439 = vrot.lane.b32.xlu0 %v438_v23, %s1718_s0  ;;  %v517_v23 = vmul.f32 %v516_v18, %v1417_v51 }
 0x1ee   : >> { %562 = vrot.lane.b32.xlu1 %v561_v24, %s1718_s0  ;;  %s1560_s0 = sld [smem:[#allocation7 + %s395_s2]] }
 0x1ef   : >> { %s649_s2 = sld [smem:[#allocation7 + %s648_s17]] }
 0x1f0   : >> { %v758_v25 = vstv %s1554_s13  ;;  %s1253_s13 = smov 126   ;;  %s669_s17 = sld [smem:[#allocation7 + %s668_s10]] }
 0x1f1   : >> { %v759_v33 = vmul.f32 %v758_v25, %v1417_v51 }
 0x23f   : >> { %v456_v28 = vpop.permute.xlu0 %455 }
 0x240   : >> { %v579_v29 = vpop.permute.xlu1 %578  ;;  %v461_v34 = vadd.f32 %v456_v28, %v417_v27  ;;  %v550_v27 = vmul.f32 %v549_v21, %v1417_v51  ;;  %v551_v28 = vmul.f32 %v549_v21, %v1419_v52 }
 0x241   : >> { %v584_v36 = vadd.f32 %v579_v29, %v540_v30  ;;  %v637_v29 = vstv %s1558_s9  ;;  %v397_v30 = vstv %s1560_s0  ;;  %s404_s0 = sadd.s32 4, %s1431_s15  ;;  %s760_s9 = sadd.s32 2, %s1452_s11 }
 0x242   : >> { %v470_v43 = vrot.slane %v461_v34, 1 }
 0x243   : >> { %v458_v35 = vpop.permute.xlu0 %457  ;;  %v593_v47 = vrot.slane %v584_v36, 1  ;;  %v615_v36 = vrot.slane %v550_v27, 2 }
 0x244   : >> { %v462_v37 = vadd.f32 %v458_v35, %v418_v31  ;;  %v581_v38 = vpop.permute.xlu1 %580  ;;  %v520_v35 = vstv %s1569_s28  ;;  %s639_s28 = sadd.s32 2, %s1445_s6 }
 0x245   : >> { %v585_v41 = vadd.f32 %v581_v38, %v541_v32  ;;  %v638_v38 = vmul.f32 %v637_v29, %v1417_v51 }
 0x246   : >> { %v471_v44 = vrot.slane %v462_v37, 1  ;;  %v616_v37 = vrot.slane %v551_v28, 2 }
 0x247   : >> { %v700_v45 = vpop.permute.xlu0 %699  ;;  %v594_v48 = vrot.slane %v585_v41, 1 }
 0x248   : >> { %475 = vrot.lane.b32.xlu1 %v471_v44, %s1720_s29  ;;  %v472_v49 = vsel %vm346_vm0, %v470_v43, %v471_v44  ;;  %v702_v50 = vpop.permute.xlu1 %701  ;;  %v705_v53 = vadd.f32 %v700_v45, %v661_v39  ;;  %v398_v39 = vmul.f32 %v397_v30, %v1417_v51  ;;  %v521_v43 = vmul.f32 %v520_v35, %v1417_v51 }
 0x249   : >> { %473 = vrot.lane.b32.xlu0 %v472_v49, %s1720_s29  ;;  %v706_v54 = vadd.f32 %v702_v50, %v662_v42  ;;  %v595_v61 = vsel %vm346_vm0, %v593_v47, %v594_v48  ;;  %v617_v44 = vsel %vm492_vm4, %v615_v36, %v616_v37 }
 0x24a   : >> { %v714_v56 = vrot.slane %v705_v53, 1 }
 0x24b   : >> { %v715_v58 = vrot.slane %v706_v54, 1  ;;  %v821_v59 = vpop.permute.xlu0 %820 }
 0x24c   : >> { %598 = vrot.lane.b32.xlu1 %v594_v48, %s1720_s29  ;;  %v823_v62 = vpop.permute.xlu1 %822  ;;  %v826_v63 = vadd.f32 %v821_v59, %v782_v46 }
 0x24d   : >> { %596 = vrot.lane.b32.xlu0 %v595_v61, %s1720_s29  ;;  %v827_v0 = vadd.f32 %v823_v62, %v783_v55  ;;  %v716_v4 = vsel %vm346_vm0, %v714_v56, %v715_v58  ;;  %v529_v56 = vstv %s528_s18  ;;  %v650_v61 = vstv %s649_s2  ;;  %s511_s2 = sld [smem:[#allocation7 + %s1437_s20]] }
 0x24e   : >> { %v835_v3 = vrot.slane %v826_v63, 1  ;;  %v530_v60 = vmul.f32 %v529_v56, %v1417_v51  ;;  %v651_v6 = vmul.f32 %v650_v61, %v1417_v51  ;;  %s1673_s20 = sld [smem:[#allocation9 + %s1428_s14]] }
 0x24f   : >> { %v836_v7 = vrot.slane %v827_v0, 1  ;;  %v1545_v8 = vpop.permute.xlu0 %445  ;;  %s743_s14 = sld [smem:[#allocation9 + %s1441_s21]] }
 0x250   : >> { %719 = vrot.lane.b32.xlu1 %v715_v58, %s1720_s29  ;;  %v1550_v9 = vpop.permute.xlu1 %447  ;;  %v531_v58 = vmul.f32 %v529_v56, %v1419_v52 }
 0x251   : >> { %717 = vrot.lane.b32.xlu0 %v716_v4, %s1720_s29  ;;  %v837_v12 = vsel %vm346_vm0, %v835_v3, %v836_v7  ;;  %s1564_s29 = sld [smem:[#allocation7 + %s424_s30]]  ;;  %s769_s30 = sadd.s32 4, %s1452_s11  ;;  %v652_v3 = vmul.f32 %v650_v61, %v1419_v52 }
 0x252   : >> { %s1618_s8 = sld [smem:[#allocation7 + %s769_s30]] }
 0x253   : >> { %v1562_v15 = vpop.permute.xlu0 %568  ;;  %s388_s30 = sld [smem:[#allocation7 + %s1431_s15]] }
 0x254   : >> { %840 = vrot.lane.b32.xlu1 %v836_v7, %s1733_s3  ;;  %v1567_v16 = vpop.permute.xlu1 %570  ;;  %v574_v5 = vadd.f32 %v1562_v15, %v530_v60  ;;  %s1678_s15 = sld [smem:[#allocation9 + %s1449_s7]] }
 0x255   : >> { %838 = vrot.lane.b32.xlu0 %v837_v12, %s1733_s3  ;;  %s1735_s3 = smov 127   ;;  %v575_v2 = vadd.f32 %v1567_v16, %v531_v58 }
 0x257   : >> { %v1577_v22 = vpop.permute.xlu0 %689  ;;  %v426_v32 = vstv %s1564_s29  ;;  %s405_s29 = sld [smem:[#allocation7 + %s404_s0]] }
 0x258   : >> { %804 = vrot.lane.b32.xlu1 %v803_v17, %s1734_s1  ;;  %v1581_v24 = vpop.permute.xlu1 %691  ;;  %v427_v40 = vmul.f32 %v426_v32, %v1417_v51  ;;  %v428_v41 = vmul.f32 %v426_v32, %v1419_v52  ;;  %s1630_s0 = sld [smem:[#allocation7 + %s639_s28]]  ;;  %v771_v7 = vstv %s1618_s8  ;;  %v695_v15 = vadd.f32 %v1577_v22, %v651_v6 }
 0x259   : >> { %683 = vrot.lane.b32.xlu0 %v682_v19, %s1734_s1  ;;  %s1626_s1 = sld [smem:[#allocation7 + %s760_s9]]  ;;  %v696_v14 = vadd.f32 %v1581_v24, %v652_v3  ;;  %v773_v16 = vmul.f32 %v771_v7, %v1419_v52  ;;  %v772_v18 = vmul.f32 %v771_v7, %v1417_v51 }
 0x25a   : >> { %v493_v47 = vrot.slane %v427_v40, 2  ;;  %v494_v48 = vrot.slane %v428_v41, 2  ;;  %s632_s8 = sld [smem:[#allocation7 + %s1445_s6]] }
 0x25b   : >> { %v1590_v31 = vpop.permute.xlu0 %810 }
 0x25c   : >> { %553 = vrot.lane.b32.xlu1 %v517_v23, %s1735_s3  ;;  %v1595_v34 = vpop.permute.xlu1 %812  ;;  %v495_v50 = vsel %vm492_vm4, %v493_v47, %v494_v48  ;;  %v816_v30 = vadd.f32 %v1590_v31, %v772_v18 }
 0x25d   : >> { %430 = vrot.lane.b32.xlu0 %v394_v26, %s1735_s3  ;;  %v406_v53 = vstv %s405_s29  ;;  %s789_s29 = sadd.s32 8, %s1452_s11  ;;  %v817_v24 = vadd.f32 %v1595_v34, %v773_v16 }
 0x25e   : >> { %v408_v54 = vmul.f32 %v406_v53, %v1419_v52  ;;  %v407_v55 = vmul.f32 %v406_v53, %v1417_v51  ;;  %s790_s18 = sld [smem:[#allocation7 + %s789_s29]]  ;;  %v641_v29 = vstv %s1630_s0 }
 0x25f   : >> { %v440_v42 = vpop.permute.xlu0 %439  ;;  %v762_v26 = vstv %s1626_s1 }
 0x260   : >> { %795 = vrot.lane.b32.xlu1 %v759_v33, %s1735_s3  ;;  %v563_v45 = vpop.permute.xlu1 %562  ;;  %v442_v46 = vadd.f32 %v440_v42, %v398_v39  ;;  %v452_v57 = vadd.f32 %v1550_v9, %v408_v54  ;;  %v451_v59 = vadd.f32 %v1545_v8, %v407_v55  ;;  %v763_v36 = vmul.f32 %v762_v26, %v1417_v51 }
 0x261   : >> { %674 = vrot.lane.b32.xlu0 %v638_v38, %s1735_s3  ;;  %v565_v49 = vadd.f32 %v563_v45, %v521_v43  ;;  %v642_v38 = vmul.f32 %v641_v29, %v1417_v51  ;;  %v501_v26 = vstv %s1673_s20 }
 0x264   : >> { %618 = vrot.lane.b32.xlu1 %v617_v44, %s1253_s13  ;;  %v791_v44 = vstv %s790_s18 }
 0x265   : >> { %464 = vrot.lane.b32.xlu0 %v442_v46, %s1253_s13  ;;  %v670_v46 = vstv %s669_s17  ;;  %v792_v47 = vmul.f32 %v791_v44, %v1417_v51  ;;  %v793_v48 = vmul.f32 %v791_v44, %v1419_v52 }
 0x267   : >> { %v857_v53 = vrot.slane %v792_v47, 2  ;;  %v858_v54 = vrot.slane %v793_v48, 2 }
 0x268   : >> { %587 = vrot.lane.b32.xlu1 %v565_v49, %s1253_s13  ;;  %v671_v49 = vmul.f32 %v670_v46, %v1417_v51 }
 0x269   : >> { %496 = vrot.lane.b32.xlu0 %v495_v50, %s1253_s13  ;;  %v672_v50 = vmul.f32 %v670_v46, %v1419_v52 }
 0x26a   : >> { %v736_v55 = vrot.slane %v671_v49, 2 }
 0x26b   : >> { %v737_v56 = vrot.slane %v672_v50, 2 }
 0x26d   : >> { %v738_v58 = vsel %vm492_vm4, %v736_v55, %v737_v56 }
 0x2ba   : >> { %v476_v62 = vpop.permute.xlu1 %475 }
 0x2bb   : >> { %v480_v63 = vadd.f32 %v476_v62, %v452_v57  ;;  %v474_v0 = vpop.permute.xlu0 %473  ;;  %v859_v57 = vsel %vm492_vm4, %v857_v53, %v858_v54 }
 0x2bc   : >> { %v479_v1 = vadd.f32 %v474_v0, %v451_v59 }
 0x2bd   : >> { %v484_v4 = vrot.slane %v480_v63, 1 }
 0x2be   : >> { %v483_v8 = vrot.slane %v479_v1, 1  ;;  %v599_v9 = vpop.permute.xlu1 %598  ;;  %v512_v1 = vstv %s511_s2 }
 0x2bf   : >> { %v603_v10 = vadd.f32 %v599_v9, %v575_v2  ;;  %v597_v11 = vpop.permute.xlu0 %596  ;;  %v389_v2 = vstv %s388_s30  ;;  %v513_v3 = vmul.f32 %v512_v1, %v1417_v51 }
 0x2c0   : >> { %v602_v12 = vadd.f32 %v597_v11, %v574_v5  ;;  %v485_v13 = vsel %vm346_vm0, %v483_v8, %v484_v4  ;;  %v390_v5 = vmul.f32 %v389_v2, %v1417_v51  ;;  %v633_v11 = vstv %s632_s8 }
 0x2c1   : >> { %v607_v17 = vrot.slane %v603_v10, 1  ;;  %v634_v16 = vmul.f32 %v633_v11, %v1417_v51 }
 0x2c2   : >> { %v606_v19 = vrot.slane %v602_v12, 1  ;;  %v720_v20 = vpop.permute.xlu1 %719 }
 0x2c3   : >> { %v724_v21 = vadd.f32 %v720_v20, %v696_v14  ;;  %v718_v23 = vpop.permute.xlu0 %717 }
 0x2c4   : >> { %v723_v25 = vadd.f32 %v718_v23, %v695_v15  ;;  %v608_v27 = vsel %vm346_vm0, %v606_v19, %v607_v17 }
 0x2c5   : >> { %v728_v28 = vrot.slane %v724_v21, 1 }
 0x2c6   : >> { %v727_v32 = vrot.slane %v723_v25, 1  ;;  %v841_v22 = vpop.permute.xlu1 %840 }
 0x2c7   : >> { %v845_v33 = vadd.f32 %v841_v22, %v817_v24  ;;  %v839_v35 = vpop.permute.xlu0 %838 }
 0x2c8   : >> { %v844_v37 = vadd.f32 %v839_v35, %v816_v30  ;;  %v729_v39 = vsel %vm346_vm0, %v727_v32, %v728_v28 }
 0x2c9   : >> { %v849_v40 = vrot.slane %v845_v33, 1 }
 0x2ca   : >> { %v848_v41 = vrot.slane %v844_v37, 1  ;;  %v805_v42 = vpop.permute.xlu1 %804 }
 0x2cb   : >> { %v807_v43 = vadd.f32 %v805_v42, %v763_v36  ;;  %v684_v34 = vpop.permute.xlu0 %683  ;;  %v744_v42 = vstv %s743_s14 }
 0x2cc   : >> { %v686_v45 = vadd.f32 %v684_v34, %v642_v38  ;;  %v850_v31 = vsel %vm346_vm0, %v848_v41, %v849_v40 }
 0x2cd   : >> { %829 = vrot.lane.b32.xlu1 %v807_v43, %s1253_s13 }
 0x2ce   : >> { %708 = vrot.lane.b32.xlu0 %v686_v45, %s1253_s13  ;;  %v554_v59 = vpop.permute.xlu1 %553 }
 0x2cf   : >> { %v431_v60 = vpop.permute.xlu0 %430  ;;  %v556_v7 = vadd.f32 %v554_v59, %v513_v3 }
 0x2d0   : >> { %v433_v9 = vadd.f32 %v431_v60, %v390_v5 }
 0x2d1   : >> { %609 = vrot.lane.b32.xlu1 %v608_v27, %s1735_s3 }
 0x2d2   : >> { %486 = vrot.lane.b32.xlu0 %v485_v13, %s1735_s3  ;;  %v796_v61 = vpop.permute.xlu1 %795 }
 0x2d3   : >> { %v675_v62 = vpop.permute.xlu0 %674 }
 0x2d4   : >> { %v677_v27 = vadd.f32 %v675_v62, %v634_v16 }
 0x2d5   : >> { %851 = vrot.lane.b32.xlu1 %v850_v31, %s1735_s3 }
 0x2d6   : >> { %730 = vrot.lane.b32.xlu0 %v729_v39, %s1735_s3  ;;  %v619_v63 = vpop.permute.xlu1 %618  ;;  %s753_s3 = sld [smem:[#allocation7 + %s1452_s11]]  ;;  %v865_v39 = vstv %s1678_s15 }
 0x2d7   : >> { %v465_v0 = vpop.permute.xlu0 %464 }
 0x2d8   : >> { %v467_v17 = vadd.f32 %v465_v0, %v433_v9 }
 0x2d9   : >> { %860 = vrot.lane.b32.xlu1 %v859_v57, %s1253_s13 }
 0x2da   : >> { %739 = vrot.lane.b32.xlu0 %v738_v58, %s1253_s13  ;;  %v588_v6 = vpop.permute.xlu1 %587  ;;  %s622_s13 = sld [smem:[#allocation9 + %s1434_s16]]  ;;  %s1051_s16 = sshll.u32 %s1242_s12, 5 }
 0x2db   : >> { %v497_v4 = vpop.permute.xlu0 %496  ;;  %v590_v14 = vadd.f32 %v588_v6, %v556_v7  ;;  %s505_s6 = scalar_lea.vmem %s1403_s19, %s1051_s16  ;;  %s383_s12 = sadd.s32 1, %s1242_s12  }
 0x2dc   : >> { %v754_v8 = vstv %s753_s3  ;;  %p380_p2 = scmp.ge.s32.totalorder %s383_s12, 32  }
 0x2dd   : >> { %v755_v13 = vmul.f32 %v754_v8, %v1417_v51 }
 0x2df   : >> { %v798_v23 = vadd.f32 %v796_v61, %v755_v13 }
 0x2e0   : >> { %v623_v20 = vstv %s622_s13 }
 0x33f   : >> { %v830_v10 = vpop.permute.xlu1 %829 }
 0x340   : >> { %v709_v12 = vpop.permute.xlu0 %708  ;;  %v832_v29 = vadd.f32 %v830_v10, %v798_v23 }
 0x341   : >> { %v711_v22 = vadd.f32 %v709_v12, %v677_v27 }
 0x343   : >> { %v610_v15 = vpop.permute.xlu1 %609 }
 0x344   : >> { %v612_v18 = vadd.f32 %v610_v15, %v590_v14  ;;  %v487_v19 = vpop.permute.xlu0 %486 }
 0x345   : >> { %v489_v21 = vadd.f32 %v487_v19, %v467_v17 }
 0x346   : >> { %v621_v25 = vadd.f32 %v619_v63, %v612_v18 }
 0x347   : >> { %v499_v24 = vadd.f32 %v497_v4, %v489_v21  ;;  %v852_v28 = vpop.permute.xlu1 %851 }
 0x348   : >> { %v624_v30 = vadd.f32 %v623_v20, %v621_v25  ;;  %v731_v32 = vpop.permute.xlu0 %730  ;;  %v854_v36 = vadd.f32 %v852_v28, %v832_v29 }
 0x349   : >> { %v502_v33 = vadd.f32 %v501_v26, %v499_v24  ;;  %v733_v38 = vadd.f32 %v731_v32, %v711_v22 }
 0x34a   : >> { %v625_v35 = vmax.f32 %v624_v30, 0.0 }
 0x34b   : >> { %v503_v37 = vmax.f32 %v502_v33, 0.0  ;;  %v861_v40 = vpop.permute.xlu1 %860 }
 0x34c   : >> { %1041 = vst.msk [vmem:[%s505_s6 + $0x8] sm:$0xff] %vm506_vm5, %v625_v35  ;;  %v863_v41 = vadd.f32 %v861_v40, %v854_v36  ;;  %v740_v43 = vpop.permute.xlu0 %739 }
 0x34d   : >> { %507 = vst.msk [vmem:[%s505_s6] sm:$0xff] %vm506_vm5, %v503_v37  ;;  %v742_v34 = vadd.f32 %v740_v43, %v733_v38  ;;  %382 = sbr.rel (!%p380_p2) target bundleno = 447 (0x1bf), region = 98 }
 0x34e   : >> { %v866_v44 = vadd.f32 %v865_v39, %v863_v41 }
 0x34f   : >> { %v745_v45 = vadd.f32 %v744_v42, %v742_v34 }
 0x350   : >> { %v867_v31 = vmax.f32 %v866_v44, 0.0 }
 0x351   : >> { %v746_v46 = vmax.f32 %v745_v45, 0.0 }
 0x352   : >> { %1047 = vst.msk [vmem:[%s505_s6 + $0x18] sm:$0xff] %vm506_vm5, %v867_v31 }
 0x353   : >> { %1044 = vst.msk [vmem:[%s505_s6 + $0x10] sm:$0xff] %vm506_vm5, %v746_v46 }
 0x354 PF: > { %s19_s24 = sadd.s32 1, %s1238_s24   ;;  %s1736_s20 = smov %s1230_s22 }
 0x355   : > { %p16_p4 = scmp.ge.s32.totalorder %s19_s24, 6   ;;  %s1737_s21 = smov %s1234_s23 }
 0x356   : > { %s1738_s22 = smov %s1741_s25  ;;  %s1739_s23 = smov %s1745_s26 }
 0x357   :  { %18 = sbr.rel (!%p16_p4) target bundleno = 10 (0xa), region = 109 }
 0x35e   :  { %901 = vsyncpa [#allocation5], 1 }
 0x35f   :  { %903 = vsyncpa [#allocation5 + $0x1], 1 }
 0x360   :  { %904 = vsyncpa [#allocation6], 1 }
 0x361   :  { %906 = vsyncpa [#allocation6 + $0x1], 1 }
 0x362   :  { %907 = vsyncpa [#allocation8], 1 }

</bundles_post_ra>
